<compile_context>
chip_gen: v7x
topology: tpu7x:2x2x1
jax: 0.10.0
libtpu: 0.0.40
codegen_flags: <defaults>
</compile_context>

<pallas_src>
import math
from functools import partial

import jax
import jax.numpy as jnp
from jax import lax
from jax.experimental import pallas as pl
from jax.experimental.pallas import tpu as pltpu


def _mha_kernel(x_ref, wq_ref, wk_ref, wv_ref, wo_ref, bo_ref, o_ref, *,
                n_heads: int, batch_block: int, approx_recip: bool, bf16_exp: bool):
    # x_ref:  (batch_block, S, d_in)        current batch rows
    # wq/wk/wv_ref: (n_heads, d_in, head_dim)   per-head projection weights (scale in W_q)
    # wo_ref: (n_heads, head_dim, d_pad)    per-head output projection (columns 0-padded)
    # bo_ref: (1, d_pad) float32
    # o_ref:  (batch_block, S, d_pad)
    S = x_ref.shape[1]
    d_in = x_ref.shape[2]
    cd = x_ref.dtype               # MXU operand dtype (f32 or bf16); weights pre-cast on host

    wq = wq_ref[...]               # (H, d_in, hd)
    wk = wk_ref[...]
    wv = wv_ref[...]
    wo = wo_ref[...]               # (H, hd, d_pad)
    bo = bo_ref[...]               # (1, d_pad) f32

    # Causal mask as a bool iota compare (no f32 (S,S) bias kept live).
    row_ids = lax.broadcasted_iota(jnp.int32, (S, S), 0)
    col_ids = lax.broadcasted_iota(jnp.int32, (S, S), 1)
    causal = (col_ids <= row_ids)[None]            # (1, S, S), broadcasts over heads

    # Short static loop over the batch rows of this block; each iteration ends with a
    # store to o_ref[b], which bounds live ranges.
    for b in range(batch_block):
        x = x_ref[b]                                        # (S, d_in)
        xh = jnp.broadcast_to(x, (n_heads, S, d_in))        # head-batched view of x

        # Head-batched projections (f32 accumulation on the MXU).
        q = jnp.einsum('hsd,hdk->hsk', xh, wq, preferred_element_type=jnp.float32)
        k = jnp.einsum('hsd,hdk->hsk', xh, wk, preferred_element_type=jnp.float32)
        v = jnp.einsum('hsd,hdk->hsk', xh, wv, preferred_element_type=jnp.float32)

        # Scores: batched dot_general contracting head_dim of both operands
        # (no explicit K transpose / relayout).
        scores = jnp.einsum('hqd,hkd->hqk', q.astype(cd), k.astype(cd),
                            preferred_element_type=jnp.float32)      # (H, S, S) f32
        scores = jnp.where(causal, scores, -1e30)

        # Numerically stable softmax; reciprocal on the EUP instead of a VPU divide.
        m = jnp.max(scores, axis=-1, keepdims=True)
        if bf16_exp:
            # bf16 exp (v6e/v7x EUP); max / denominator stay f32.
            p = jnp.exp((scores - m).astype(jnp.bfloat16))
            denom = jnp.sum(p.astype(jnp.float32), axis=-1, keepdims=True)
            inv = pl.reciprocal(denom, approx=approx_recip).astype(jnp.bfloat16)
            attn = (p * inv).astype(cd)
        else:
            p = jnp.exp(scores - m)
            denom = jnp.sum(p, axis=-1, keepdims=True)
            attn = (p * pl.reciprocal(denom, approx=approx_recip)).astype(cd)
        # NOTE: dropout on attn is identity (inference semantics).

        ctx = jnp.einsum('hqk,hkd->hqd', attn, v.astype(cd),
                         preferred_element_type=jnp.float32)         # (H, S, hd)

        # Head-batched output projection, reduced over heads in vregs (no VMEM scratch).
        out_h = jnp.einsum('hsk,hko->hso', ctx.astype(cd), wo,
                           preferred_element_type=jnp.float32)       # (H, S, d_pad)
        out_b = jnp.sum(out_h, axis=0) + bo                          # (S, d_pad) f32
        o_ref[b] = out_b.astype(o_ref.dtype)                         # single lane-dense store


def _prepare_params(w_q, w_k, w_v, w_o, b_o, *, n_heads: int, compute_dtype):
    """Host-side weight preprocessing.  Call once and reuse (hoist out of the hot path)."""
    d_in, d_out = w_q.shape
    assert d_out % n_heads == 0, "d_out must be divisible by n_heads"
    head_dim = d_out // n_heads
    d_pad = ((d_out + 127) // 128) * 128          # lane-dense output slab
    scale = 1.0 / math.sqrt(head_dim)

    def split_heads(w):                            # (d_in, d_out) -> (n_heads, d_in, head_dim)
        return jnp.transpose(w.reshape(d_in, n_heads, head_dim), (1, 0, 2))

    wq3 = split_heads(w_q * scale).astype(compute_dtype)   # fold 1/sqrt(hd) into W_q
    wk3 = split_heads(w_k).astype(compute_dtype)
    wv3 = split_heads(w_v).astype(compute_dtype)

    wo3 = w_o.reshape(n_heads, head_dim, d_out)            # per-head rows of W_o
    bo = b_o
    if d_pad != d_out:                                      # zero-pad output columns to 128k
        wo3 = jnp.pad(wo3, ((0, 0), (0, 0), (0, d_pad - d_out)))
        bo = jnp.pad(b_o, (0, d_pad - d_out))
    wo3 = wo3.astype(compute_dtype)
    bo2 = bo.reshape(1, d_pad).astype(jnp.float32)
    return wq3, wk3, wv3, wo3, bo2, head_dim, d_pad


def multihead_attention(x, w_q, w_k, w_v, w_o, b_o, *, n_heads: int,
                        batch_block=None, approx_recip=None):
    """x: (B, S, d_in); w_q/w_k/w_v: (d_in, d_out); w_o: (d_out, d_out); b_o: (d_out,)."""
    B, S, d_in = x.shape
    d_out = w_q.shape[1]
    assert d_out % n_heads == 0, "d_out must be divisible by n_heads"
    compute_dtype = x.dtype
    if approx_recip is None:
        # exact reciprocal for f32 parity; fast EUP approx when already in bf16
        approx_recip = (compute_dtype != jnp.float32)
    bf16_exp = (compute_dtype == jnp.bfloat16)

    wq3, wk3, wv3, wo3, bo2, head_dim, d_pad = _prepare_params(
        w_q, w_k, w_v, w_o, b_o, n_heads=n_heads, compute_dtype=compute_dtype)

    if batch_block is None:
        # Amortize the ~0.35us/step grid overhead: several batch rows per step,
        # chosen as the largest divisor of B with batch_block * S <= ~256 rows.
        cap = max(1, 256 // S)
        batch_block = 1
        for d in range(1, B + 1):
            if B % d == 0 and d <= cap:
                batch_block = d
    assert B % batch_block == 0
    grid = (B // batch_block,)

    kernel = partial(_mha_kernel, n_heads=n_heads, batch_block=batch_block,
                     approx_recip=bool(approx_recip), bf16_exp=bf16_exp)

    out = pl.pallas_call(
        kernel,
        out_shape=jax.ShapeDtypeStruct((B, S, d_pad), x.dtype),
        grid_spec=pltpu.PrefetchScalarGridSpec(
            num_scalar_prefetch=0,
            grid=grid,
            in_specs=[
                pl.BlockSpec((batch_block, S, d_in), lambda b: (b, 0, 0)),       # x
                pl.BlockSpec((n_heads, d_in, head_dim), lambda b: (0, 0, 0)),    # W_q (scaled)
                pl.BlockSpec((n_heads, d_in, head_dim), lambda b: (0, 0, 0)),    # W_k
                pl.BlockSpec((n_heads, d_in, head_dim), lambda b: (0, 0, 0)),    # W_v
                pl.BlockSpec((n_heads, head_dim, d_pad), lambda b: (0, 0, 0)),   # W_o (padded)
                pl.BlockSpec((1, d_pad), lambda b: (0, 0)),                      # b_o (padded)
            ],
            out_specs=pl.BlockSpec((batch_block, S, d_pad), lambda b: (b, 0, 0)),
        ),
        compiler_params=pltpu.CompilerParams(
            dimension_semantics=("parallel",),
            vmem_limit_bytes=32 * 1024 * 1024),
    )(x, wq3, wk3, wv3, wo3, bo2)

    if d_pad != d_out:
        out = out[..., :d_out]
    return out


def _reference(x, w_q, w_k, w_v, w_o, b_o, n_heads):
    hp = jax.lax.Precision.HIGHEST
    B, S, d_in = x.shape
    d_out = w_q.shape[1]
    hd = d_out // n_heads
    q = jnp.einsum('bsd,de->bse', x, w_q, precision=hp).reshape(B, S, n_heads, hd).transpose(0, 2, 1, 3)
    k = jnp.einsum('bsd,de->bse', x, w_k, precision=hp).reshape(B, S, n_heads, hd).transpose(0, 2, 1, 3)
    v = jnp.einsum('bsd,de->bse', x, w_v, precision=hp).reshape(B, S, n_heads, hd).transpose(0, 2, 1, 3)
    scores = jnp.einsum('bhqd,bhkd->bhqk', q, k, precision=hp) / math.sqrt(hd)
    mask = jnp.triu(jnp.ones((S, S), bool), k=1)
    scores = jnp.where(mask, -jnp.inf, scores)
    attn = jax.nn.softmax(scores, axis=-1)
    ctx = jnp.einsum('bhqk,bhkd->bhqd', attn, v, precision=hp).transpose(0, 2, 1, 3).reshape(B, S, d_out)
    return jnp.einsum('bsd,de->bse', ctx, w_o, precision=hp) + b_o


if __name__ == "__main__":
    # small shapes consistent with the module: batch=2, seq=8, d_in=32, d_out=32,
    # n_heads=4, context_length=8, dropout=0.0, qkv_bias=False
    B, S, D_IN, D_OUT, N_HEADS = 2, 8, 32, 32, 4

    key = jax.random.PRNGKey(0)
    kx, kq, kk, kv, ko, kb = jax.random.split(key, 6)

    x = jax.random.normal(kx, (B, S, D_IN), dtype=jnp.float32)

    lim_in = 1.0 / math.sqrt(D_IN)
    lim_out = 1.0 / math.sqrt(D_OUT)
    w_q = jax.random.uniform(kq, (D_IN, D_OUT), minval=-lim_in, maxval=lim_in, dtype=jnp.float32)
    w_k = jax.random.uniform(kk, (D_IN, D_OUT), minval=-lim_in, maxval=lim_in, dtype=jnp.float32)
    w_v = jax.random.uniform(kv, (D_IN, D_OUT), minval=-lim_in, maxval=lim_in, dtype=jnp.float32)
    w_o = jax.random.uniform(ko, (D_OUT, D_OUT), minval=-lim_out, maxval=lim_out, dtype=jnp.float32)
    b_o = jax.random.uniform(kb, (D_OUT,), minval=-lim_out, maxval=lim_out, dtype=jnp.float32)

    ref = _reference(x, w_q, w_k, w_v, w_o, b_o, N_HEADS)

    # f32 path (tolerance covers MXU pass-precision differences vs the HIGHEST-precision ref).
    out = multihead_attention(x, w_q, w_k, w_v, w_o, b_o, n_heads=N_HEADS)
    out = jax.block_until_ready(out)
    assert out.shape == (B, S, D_OUT)
    assert jnp.allclose(out, ref, atol=5e-3, rtol=5e-3), \
        f"f32 mismatch: max abs err {jnp.max(jnp.abs(out - ref))}"

    # bf16 hot path (bf16 MXU operands + bf16 exp, f32 accumulation, approx reciprocal).
    out_bf16 = multihead_attention(x.astype(jnp.bfloat16),
                                   w_q, w_k, w_v, w_o, b_o, n_heads=N_HEADS)
    out_bf16 = jax.block_until_ready(out_bf16)
    assert jnp.allclose(out_bf16.astype(jnp.float32), ref, atol=1e-1, rtol=1e-1), \
        f"bf16 mismatch: max abs err {jnp.max(jnp.abs(out_bf16.astype(jnp.float32) - ref))}"

    print("KERNEL_OK")
</pallas_src>

<mosaic_0001>
module attributes {stable_mosaic.version = 11 : i64} {
  func.func @_mha_kernel(%arg0: i32, %arg1: memref<2x8x32xf32, #tpu.memory_space<vmem>>, %arg2: memref<4x32x8xf32, #tpu.memory_space<vmem>>, %arg3: memref<4x32x8xf32, #tpu.memory_space<vmem>>, %arg4: memref<4x32x8xf32, #tpu.memory_space<vmem>>, %arg5: memref<4x8x128xf32, #tpu.memory_space<vmem>>, %arg6: memref<1x128xf32, #tpu.memory_space<vmem>>, %arg7: memref<2x8x128xf32, #tpu.memory_space<vmem>>) attributes {dimension_semantics = [#tpu.dimension_semantics<parallel>], iteration_bounds = array<i64: 1>, scalar_prefetch = 0 : i64, scratch_operands = 0 : i64, tpu.core_type = #tpu.core_type<tc>, window_params = [{transform_indices = @transform_0, window_bounds = array<i64: 2, 8, 32>}, {pipeline_mode = #tpu.pipeline_mode<synchronous>, transform_indices = @transform_1, window_bounds = array<i64: 4, 32, 8>}, {pipeline_mode = #tpu.pipeline_mode<synchronous>, transform_indices = @transform_2, window_bounds = array<i64: 4, 32, 8>}, {pipeline_mode = #tpu.pipeline_mode<synchronous>, transform_indices = @transform_3, window_bounds = array<i64: 4, 32, 8>}, {pipeline_mode = #tpu.pipeline_mode<synchronous>, transform_indices = @transform_4, window_bounds = array<i64: 4, 8, 128>}, {pipeline_mode = #tpu.pipeline_mode<synchronous>, transform_indices = @transform_5, window_bounds = array<i64: 1, 128>}, {transform_indices = @transform_6, window_bounds = array<i64: 2, 8, 128>}]} {
    %c0 = arith.constant 0 : index
    %c0_0 = arith.constant 0 : index
    %c0_1 = arith.constant 0 : index
    %0 = vector.load %arg2[%c0, %c0_0, %c0_1] : memref<4x32x8xf32, #tpu.memory_space<vmem>>, vector<4x32x8xf32>
    %c0_2 = arith.constant 0 : index
    %c0_3 = arith.constant 0 : index
    %c0_4 = arith.constant 0 : index
    %1 = vector.load %arg3[%c0_2, %c0_3, %c0_4] : memref<4x32x8xf32, #tpu.memory_space<vmem>>, vector<4x32x8xf32>
    %c0_5 = arith.constant 0 : index
    %c0_6 = arith.constant 0 : index
    %c0_7 = arith.constant 0 : index
    %2 = vector.load %arg4[%c0_5, %c0_6, %c0_7] : memref<4x32x8xf32, #tpu.memory_space<vmem>>, vector<4x32x8xf32>
    %c0_8 = arith.constant 0 : index
    %c0_9 = arith.constant 0 : index
    %c0_10 = arith.constant 0 : index
    %3 = vector.load %arg5[%c0_8, %c0_9, %c0_10] : memref<4x8x128xf32, #tpu.memory_space<vmem>>, vector<4x8x128xf32>
    %c0_11 = arith.constant 0 : index
    %c0_12 = arith.constant 0 : index
    %4 = vector.load %arg6[%c0_11, %c0_12] : memref<1x128xf32, #tpu.memory_space<vmem>>, vector<1x128xf32>
    %5 = tpu.iota {dimensions = array<i32: 0>} : vector<8x8xi32>
    %6 = tpu.iota {dimensions = array<i32: 1>} : vector<8x8xi32>
    %7 = arith.cmpi sle, %6, %5 : vector<8x8xi32>
    %8 = vector.shape_cast %7 : vector<8x8xi1> to vector<1x8x8xi1>
    %c0_13 = arith.constant 0 : index
    %c0_14 = arith.constant 0 : index
    %c0_15 = arith.constant 0 : index
    %9 = vector.load %arg1[%c0_13, %c0_14, %c0_15] : memref<2x8x32xf32, #tpu.memory_space<vmem>>, vector<1x8x32xf32>
    %10 = vector.shape_cast %9 : vector<1x8x32xf32> to vector<8x32xf32>
    %11 = vector.shape_cast %10 : vector<8x32xf32> to vector<1x8x32xf32>
    %12 = vector.broadcast %11 : vector<1x8x32xf32> to vector<4x8x32xf32>
    "tpu.trace_start"() <{level = 10 : i32, message = "hsd,hdk->hsk"}> : () -> ()
    %cst = arith.constant dense<0.000000e+00> : vector<4x8x8xf32>
    %13 = tpu.matmul %12, %0, %cst {dimension_numbers = #tpu.dot_dimension_numbers<[2], [1], [1], [2], [0, 0, 0, 1, 1, 2], [0], [0]>} : vector<4x8x32xf32>, vector<4x32x8xf32>, vector<4x8x8xf32> -> vector<4x8x8xf32>
    %cst_16 = arith.constant dense<0.000000e+00> : vector<4x8x8xf32>
    %14 = tpu.matmul %12, %1, %cst_16 {dimension_numbers = #tpu.dot_dimension_numbers<[2], [1], [1], [2], [0, 0, 0, 1, 1, 2], [0], [0]>} : vector<4x8x32xf32>, vector<4x32x8xf32>, vector<4x8x8xf32> -> vector<4x8x8xf32>
    %cst_17 = arith.constant dense<0.000000e+00> : vector<4x8x8xf32>
    %15 = tpu.matmul %12, %2, %cst_17 {dimension_numbers = #tpu.dot_dimension_numbers<[2], [1], [1], [2], [0, 0, 0, 1, 1, 2], [0], [0]>} : vector<4x8x32xf32>, vector<4x32x8xf32>, vector<4x8x8xf32> -> vector<4x8x8xf32>
    "tpu.trace_stop"() : () -> ()
    "tpu.trace_start"() <{level = 10 : i32, message = "hqd,hkd->hqk"}> : () -> ()
    %cst_18 = arith.constant dense<0.000000e+00> : vector<4x8x8xf32>
    %16 = tpu.matmul %13, %14, %cst_18 {dimension_numbers = #tpu.dot_dimension_numbers<[2], [2], [1], [1], [0, 0, 0, 1, 1, 1], [0], [0]>} : vector<4x8x8xf32>, vector<4x8x8xf32>, vector<4x8x8xf32> -> vector<4x8x8xf32>
    %cst_19 = arith.constant -1.000000e+30 : f32
    "tpu.trace_stop"() : () -> ()
    %17 = vector.shape_cast %8 : vector<1x8x8xi1> to vector<1x8x8xi1>
    %18 = vector.broadcast %17 : vector<1x8x8xi1> to vector<4x8x8xi1>
    %19 = vector.broadcast %cst_19 : f32 to vector<4x8x8xf32>
    %20 = arith.select %18, %16, %19 : vector<4x8x8xi1>, vector<4x8x8xf32>
    %cst_20 = arith.constant dense<0xFF800000> : vector<4x8xf32>
    %21 = vector.multi_reduction <maximumf>, %20, %cst_20 [2] : vector<4x8x8xf32> to vector<4x8xf32>
    %22 = vector.shape_cast %21 : vector<4x8xf32> to vector<4x8x1xf32>
    %23 = vector.broadcast %22 : vector<4x8x1xf32> to vector<4x8x8xf32>
    %24 = arith.subf %20, %23 : vector<4x8x8xf32>
    %25 = math.exp %24 : vector<4x8x8xf32>
    %cst_21 = arith.constant dense<0.000000e+00> : vector<4x8xf32>
    %26 = vector.multi_reduction <add>, %25, %cst_21 [2] : vector<4x8x8xf32> to vector<4x8xf32>
    %27 = vector.shape_cast %26 : vector<4x8xf32> to vector<4x8x1xf32>
    %28 = tpu.reciprocal %27 : vector<4x8x1xf32> -> vector<4x8x1xf32>
    %29 = vector.broadcast %28 : vector<4x8x1xf32> to vector<4x8x8xf32>
    %30 = arith.mulf %25, %29 : vector<4x8x8xf32>
    "tpu.trace_start"() <{level = 10 : i32, message = "hqk,hkd->hqd"}> : () -> ()
    %cst_22 = arith.constant dense<0.000000e+00> : vector<4x8x8xf32>
    %31 = tpu.matmul %30, %15, %cst_22 {dimension_numbers = #tpu.dot_dimension_numbers<[2], [1], [1], [2], [0, 0, 0, 1, 1, 2], [0], [0]>} : vector<4x8x8xf32>, vector<4x8x8xf32>, vector<4x8x8xf32> -> vector<4x8x8xf32>
    "tpu.trace_stop"() : () -> ()
    "tpu.trace_start"() <{level = 10 : i32, message = "hsk,hko->hso"}> : () -> ()
    %cst_23 = arith.constant dense<0.000000e+00> : vector<4x8x128xf32>
    %32 = tpu.matmul %31, %3, %cst_23 {dimension_numbers = #tpu.dot_dimension_numbers<[2], [1], [1], [2], [0, 0, 0, 1, 1, 2], [0], [0]>} : vector<4x8x8xf32>, vector<4x8x128xf32>, vector<4x8x128xf32> -> vector<4x8x128xf32>
    "tpu.trace_stop"() : () -> ()
    %cst_24 = arith.constant dense<0.000000e+00> : vector<8x128xf32>
    %33 = vector.multi_reduction <add>, %32, %cst_24 [0] : vector<4x8x128xf32> to vector<8x128xf32>
    %34 = vector.broadcast %4 : vector<1x128xf32> to vector<8x128xf32>
    %35 = arith.addf %33, %34 : vector<8x128xf32>
    %c0_25 = arith.constant 0 : index
    %c0_26 = arith.constant 0 : index
    %c0_27 = arith.constant 0 : index
    %36 = vector.load %arg7[%c0_25, %c0_26, %c0_27] : memref<2x8x128xf32, #tpu.memory_space<vmem>>, vector<1x8x128xf32>
    %37 = vector.shape_cast %36 : vector<1x8x128xf32> to vector<8x128xf32>
    %38 = vector.shape_cast %35 : vector<8x128xf32> to vector<1x8x128xf32>
    tpu.vector_store %arg7[%c0_25, %c0_26, %c0_27], %38 {strides = array<i32>} : memref<2x8x128xf32, #tpu.memory_space<vmem>>, vector<1x8x128xf32>,
    %c1 = arith.constant 1 : index
    %c0_28 = arith.constant 0 : index
    %c0_29 = arith.constant 0 : index
    %39 = vector.load %arg1[%c1, %c0_28, %c0_29] : memref<2x8x32xf32, #tpu.memory_space<vmem>>, vector<1x8x32xf32>
    %40 = vector.shape_cast %39 : vector<1x8x32xf32> to vector<8x32xf32>
    %41 = vector.shape_cast %40 : vector<8x32xf32> to vector<1x8x32xf32>
    %42 = vector.broadcast %41 : vector<1x8x32xf32> to vector<4x8x32xf32>
    "tpu.trace_start"() <{level = 10 : i32, message = "hsd,hdk->hsk"}> : () -> ()
    %cst_30 = arith.constant dense<0.000000e+00> : vector<4x8x8xf32>
    %43 = tpu.matmul %42, %0, %cst_30 {dimension_numbers = #tpu.dot_dimension_numbers<[2], [1], [1], [2], [0, 0, 0, 1, 1, 2], [0], [0]>} : vector<4x8x32xf32>, vector<4x32x8xf32>, vector<4x8x8xf32> -> vector<4x8x8xf32>
    %cst_31 = arith.constant dense<0.000000e+00> : vector<4x8x8xf32>
    %44 = tpu.matmul %42, %1, %cst_31 {dimension_numbers = #tpu.dot_dimension_numbers<[2], [1], [1], [2], [0, 0, 0, 1, 1, 2], [0], [0]>} : vector<4x8x32xf32>, vector<4x32x8xf32>, vector<4x8x8xf32> -> vector<4x8x8xf32>
    %cst_32 = arith.constant dense<0.000000e+00> : vector<4x8x8xf32>
    %45 = tpu.matmul %42, %2, %cst_32 {dimension_numbers = #tpu.dot_dimension_numbers<[2], [1], [1], [2], [0, 0, 0, 1, 1, 2], [0], [0]>} : vector<4x8x32xf32>, vector<4x32x8xf32>, vector<4x8x8xf32> -> vector<4x8x8xf32>
    "tpu.trace_stop"() : () -> ()
    "tpu.trace_start"() <{level = 10 : i32, message = "hqd,hkd->hqk"}> : () -> ()
    %cst_33 = arith.constant dense<0.000000e+00> : vector<4x8x8xf32>
    %46 = tpu.matmul %43, %44, %cst_33 {dimension_numbers = #tpu.dot_dimension_numbers<[2], [2], [1], [1], [0, 0, 0, 1, 1, 1], [0], [0]>} : vector<4x8x8xf32>, vector<4x8x8xf32>, vector<4x8x8xf32> -> vector<4x8x8xf32>
    %cst_34 = arith.constant -1.000000e+30 : f32
    "tpu.trace_stop"() : () -> ()
    %47 = vector.shape_cast %8 : vector<1x8x8xi1> to vector<1x8x8xi1>
    %48 = vector.broadcast %47 : vector<1x8x8xi1> to vector<4x8x8xi1>
    %49 = vector.broadcast %cst_34 : f32 to vector<4x8x8xf32>
    %50 = arith.select %48, %46, %49 : vector<4x8x8xi1>, vector<4x8x8xf32>
    %cst_35 = arith.constant dense<0xFF800000> : vector<4x8xf32>
    %51 = vector.multi_reduction <maximumf>, %50, %cst_35 [2] : vector<4x8x8xf32> to vector<4x8xf32>
    %52 = vector.shape_cast %51 : vector<4x8xf32> to vector<4x8x1xf32>
    %53 = vector.broadcast %52 : vector<4x8x1xf32> to vector<4x8x8xf32>
    %54 = arith.subf %50, %53 : vector<4x8x8xf32>
    %55 = math.exp %54 : vector<4x8x8xf32>
    %cst_36 = arith.constant dense<0.000000e+00> : vector<4x8xf32>
    %56 = vector.multi_reduction <add>, %55, %cst_36 [2] : vector<4x8x8xf32> to vector<4x8xf32>
    %57 = vector.shape_cast %56 : vector<4x8xf32> to vector<4x8x1xf32>
    %58 = tpu.reciprocal %57 : vector<4x8x1xf32> -> vector<4x8x1xf32>
    %59 = vector.broadcast %58 : vector<4x8x1xf32> to vector<4x8x8xf32>
    %60 = arith.mulf %55, %59 : vector<4x8x8xf32>
    "tpu.trace_start"() <{level = 10 : i32, message = "hqk,hkd->hqd"}> : () -> ()
    %cst_37 = arith.constant dense<0.000000e+00> : vector<4x8x8xf32>
    %61 = tpu.matmul %60, %45, %cst_37 {dimension_numbers = #tpu.dot_dimension_numbers<[2], [1], [1], [2], [0, 0, 0, 1, 1, 2], [0], [0]>} : vector<4x8x8xf32>, vector<4x8x8xf32>, vector<4x8x8xf32> -> vector<4x8x8xf32>
    "tpu.trace_stop"() : () -> ()
    "tpu.trace_start"() <{level = 10 : i32, message = "hsk,hko->hso"}> : () -> ()
    %cst_38 = arith.constant dense<0.000000e+00> : vector<4x8x128xf32>
    %62 = tpu.matmul %61, %3, %cst_38 {dimension_numbers = #tpu.dot_dimension_numbers<[2], [1], [1], [2], [0, 0, 0, 1, 1, 2], [0], [0]>} : vector<4x8x8xf32>, vector<4x8x128xf32>, vector<4x8x128xf32> -> vector<4x8x128xf32>
    "tpu.trace_stop"() : () -> ()
    %cst_39 = arith.constant dense<0.000000e+00> : vector<8x128xf32>
    %63 = vector.multi_reduction <add>, %62, %cst_39 [0] : vector<4x8x128xf32> to vector<8x128xf32>
    %64 = vector.broadcast %4 : vector<1x128xf32> to vector<8x128xf32>
    %65 = arith.addf %63, %64 : vector<8x128xf32>
    %c1_40 = arith.constant 1 : index
    %c0_41 = arith.constant 0 : index
    %c0_42 = arith.constant 0 : index
    %66 = vector.load %arg7[%c1_40, %c0_41, %c0_42] : memref<2x8x128xf32, #tpu.memory_space<vmem>>, vector<1x8x128xf32>
    %67 = vector.shape_cast %66 : vector<1x8x128xf32> to vector<8x128xf32>
    %68 = vector.shape_cast %65 : vector<8x128xf32> to vector<1x8x128xf32>
    tpu.vector_store %arg7[%c1_40, %c0_41, %c0_42], %68 {strides = array<i32>} : memref<2x8x128xf32, #tpu.memory_space<vmem>>, vector<1x8x128xf32>,
    return
  }
  func.func @transform_0(%arg0: i32) -> (i32, i32, i32) {
    %c0_i32 = arith.constant 0 : i32
    %c0_i32_0 = arith.constant 0 : i32
    %c0_i32_1 = arith.constant 0 : i32
    return %arg0, %c0_i32, %c0_i32_0 : i32, i32, i32
  }
  func.func @transform_1(%arg0: i32) -> (i32, i32, i32) {
    %c0_i32 = arith.constant 0 : i32
    %c0_i32_0 = arith.constant 0 : i32
    %c0_i32_1 = arith.constant 0 : i32
    %c0_i32_2 = arith.constant 0 : i32
    return %c0_i32, %c0_i32_0, %c0_i32_1 : i32, i32, i32
  }
  func.func @transform_2(%arg0: i32) -> (i32, i32, i32) {
    %c0_i32 = arith.constant 0 : i32
    %c0_i32_0 = arith.constant 0 : i32
    %c0_i32_1 = arith.constant 0 : i32
    %c0_i32_2 = arith.constant 0 : i32
    return %c0_i32, %c0_i32_0, %c0_i32_1 : i32, i32, i32
  }
  func.func @transform_3(%arg0: i32) -> (i32, i32, i32) {
    %c0_i32 = arith.constant 0 : i32
    %c0_i32_0 = arith.constant 0 : i32
    %c0_i32_1 = arith.constant 0 : i32
    %c0_i32_2 = arith.constant 0 : i32
    return %c0_i32, %c0_i32_0, %c0_i32_1 : i32, i32, i32
  }
  func.func @transform_4(%arg0: i32) -> (i32, i32, i32) {
    %c0_i32 = arith.constant 0 : i32
    %c0_i32_0 = arith.constant 0 : i32
    %c0_i32_1 = arith.constant 0 : i32
    %c0_i32_2 = arith.constant 0 : i32
    return %c0_i32, %c0_i32_0, %c0_i32_1 : i32, i32, i32
  }
  func.func @transform_5(%arg0: i32) -> (i32, i32) {
    %c0_i32 = arith.constant 0 : i32
    %c0_i32_0 = arith.constant 0 : i32
    %c0_i32_1 = arith.constant 0 : i32
    return %c0_i32, %c0_i32_0 : i32, i32
  }
  func.func @transform_6(%arg0: i32) -> (i32, i32, i32) {
    %c0_i32 = arith.constant 0 : i32
    %c0_i32_0 = arith.constant 0 : i32
    %c0_i32_1 = arith.constant 0 : i32
    return %arg0, %c0_i32, %c0_i32_0 : i32, i32, i32
  }
}

</mosaic_0001>

<bundles_post_ra>
// kernel: tpu_custom_call.1
= control target key start
LH: loop header
LB: loop body
LE: loop exit
PB: predicated region body
PF: predicated region fallthrough
CT: control target
= control target key end

     0   :  { %v4496_v3 = vmov 0.0|0.0   ;;  %vm4497_vm0 = vmmov 0   ;;  %v4498_v11 = vmov 0.0   ;;  %vm83_vm1 = vcmask 261120   ;;  %s5130_s0 = inlined_call_operand.vmem [shape: f32[2,8,32], index: 0, kind: input, shape index: {}]   ;;  %s5131_s1 = inlined_call_operand.vmem [shape: f32[4,32,8], index: 1, kind: input, shape index: {}]   ;;  %s5132_s2 = inlined_call_operand.vmem [shape: f32[4,32,8], index: 2, kind: input, shape index: {}]   ;;  %s5133_s3 = inlined_call_operand.vmem [shape: f32[4,32,8], index: 3, kind: input, shape index: {}]   ;;  %s5134_s4 = inlined_call_operand.vmem [shape: f32[4,8,128], index: 4, kind: input, shape index: {}]   ;;  %s5135_s5 = inlined_call_operand.vmem [shape: f32[1,128], index: 5, kind: input, shape index: {}]   ;;  %s5136_s6 = inlined_call_operand.hbm [shape: f32[2,8,128], index: 6, kind: output, shape index: {}]  }
   0x1   :  { %v24_v0 = vld [vmem:[%s5131_s1] sm:$0xff]  ;;  %v25_v1 = vld [vmem:[%s5131_s1 + $0x8] sm:$0xff]  ;;  %4290 = vmatprep.subr.bf16.mxu0 %v4496_v3  ;;  %4296 = vmatprep.subr.bf16.mxu1 %v4496_v3  ;;  %v26_v6 = vld [vmem:[%s5131_s1 + $0x10] sm:$0xff] }
   0x2   :  { %v28_v2 = vld [vmem:[%s5131_s1 + $0x20] sm:$0xff]  ;;  %v4548_v4 = vpack.c.bf16 %v25_v1, %v24_v0  ;;  %v29_v5 = vld [vmem:[%s5131_s1 + $0x28] sm:$0xff]  ;;  %v27_v7 = vld [vmem:[%s5131_s1 + $0x18] sm:$0xff]  ;;  %3914 = vmatprep.mubr.msk.f32.mxu0 %vm4497_vm0, %v4498_v11  ;;  %3925 = vmatprep.mubr.msk.f32.mxu1 %vm4497_vm0, %v4498_v11 }
   0x3   :  { %v4559_v8 = vpack.c.bf16 %v29_v5, %v28_v2  ;;  %v30_v9 = vld [vmem:[%s5131_s1 + $0x30] sm:$0xff]  ;;  %v31_v10 = vld [vmem:[%s5131_s1 + $0x38] sm:$0xff]  ;;  %v4572_v12 = vpack.c.bf16 %v27_v7, %v26_v6  ;;  %v32_v14 = vld [vmem:[%s5131_s1 + $0x40] sm:$0xff] }
   0x4   :  { %4292 = vmatpush3.bf16.msra.mxu0 %v4548_v4  ;;  %v4576_v13 = vpack.c.bf16 %v31_v10, %v30_v9  ;;  %v33_v15 = vld [vmem:[%s5131_s1 + $0x48] sm:$0xff]  ;;  %v36_v16 = vld [vmem:[%s5131_s1 + $0x60] sm:$0xff]  ;;  %v34_v21 = vld [vmem:[%s5131_s1 + $0x50] sm:$0xff] }
   0x5   :  { %4298 = vmatpush3.bf16.msra.mxu1 %v4559_v8  ;;  %4293 = vmatprep.subr.bf16.mxu0 %v4496_v3  ;;  %v37_v17 = vld [vmem:[%s5131_s1 + $0x68] sm:$0xff]  ;;  %v4595_v18 = vld [vmem:[%s5130_s0] sm:$0xff]  ;;  %v4597_v19 = vpack.c.bf16 %v33_v15, %v32_v14  ;;  %v35_v22 = vld [vmem:[%s5131_s1 + $0x58] sm:$0xff] }
   0x6   :  { %4299 = vmatprep.subr.bf16.mxu1 %v4496_v3  ;;  %v4601_v20 = vpack.c.bf16 %v37_v17, %v36_v16  ;;  %v38_v23 = vld [vmem:[%s5131_s1 + $0x70] sm:$0xff]  ;;  %v39_v24 = vld [vmem:[%s5131_s1 + $0x78] sm:$0xff]  ;;  %v4621_v25 = vpack.c.bf16 %v35_v22, %v34_v21  ;;  %v40_v27 = vld [vmem:[%s5132_s2] sm:$0xff] }
   0x7   :  { %v4625_v26 = vpack.c.bf16 %v39_v24, %v38_v23  ;;  %v41_v28 = vld [vmem:[%s5132_s2 + $0x8] sm:$0xff] }
   0x8   :  { %4295 = vmatpush3.bf16.msra.mxu0 %v4572_v12 }
   0x9   :  { %4301 = vmatpush3.bf16.msra.mxu1 %v4576_v13  ;;  %4302 = vmatprep.subr.bf16.mxu0 %v4496_v3 }
   0xa   :  { %4308 = vmatprep.subr.bf16.mxu1 %v4496_v3 }
   0xb   :  { %3915 = vmatmul.mubr.msk.f32.vlgmr.msra.gmra.mrb[0].mxu0 %vm83_vm1, %v4595_v18 }
   0xc   :  { %3926 = vmatmul.mubr.msk.f32.vlgmr.msra.gmra.mrb[0].mxu1 %vm83_vm1, %v4595_v18  ;;  %4304 = vmatpush3.bf16.msra.mxu0 %v4597_v19 }
   0xd   :  { %4310 = vmatpush3.bf16.msra.mxu1 %v4601_v20  ;;  %4305 = vmatprep.subr.bf16.mxu0 %v4496_v3 }
   0xe   :  { %11 = vsyncpa [#allocation3], 0  ;;  %4311 = vmatprep.subr.bf16.mxu1 %v4496_v3  ;;  %3936 = vmatprep.mubr.msk.f32.mxu0 %vm4497_vm0, %v4498_v11  ;;  %v44_v29 = vld [vmem:[%s5132_s2 + $0x20] sm:$0xff]  ;;  %v45_v30 = vld [vmem:[%s5132_s2 + $0x28] sm:$0xff]  ;;  %v4645_v31 = vpack.c.bf16 %v41_v28, %v40_v27  ;;  %vm927_vm2 = vcmask 64512  }
   0xf   :  { %3947 = vmatprep.mubr.msk.f32.mxu1 %vm4497_vm0, %v4498_v11  ;;  %v4649_v32 = vpack.c.bf16 %v45_v30, %v44_v29  ;;  %v42_v33 = vld [vmem:[%s5132_s2 + $0x10] sm:$0xff]  ;;  %v43_v34 = vld [vmem:[%s5132_s2 + $0x18] sm:$0xff]  ;;  %v48_v39 = vld [vmem:[%s5132_s2 + $0x40] sm:$0xff] }
  0x10   :  { %4307 = vmatpush3.bf16.msra.mxu0 %v4621_v25  ;;  %v46_v35 = vld [vmem:[%s5132_s2 + $0x30] sm:$0xff]  ;;  %v47_v36 = vld [vmem:[%s5132_s2 + $0x38] sm:$0xff]  ;;  %v4669_v37 = vpack.c.bf16 %v43_v34, %v42_v33  ;;  %v49_v40 = vld [vmem:[%s5132_s2 + $0x48] sm:$0xff] }
  0x11   :  { %4313 = vmatpush3.bf16.msra.mxu1 %v4625_v26  ;;  %4314 = vmatprep.subr.bf16.mxu0 %v4496_v3  ;;  %v4673_v38 = vpack.c.bf16 %v47_v36, %v46_v35  ;;  %v52_v41 = vld [vmem:[%s5132_s2 + $0x60] sm:$0xff]  ;;  %v53_v42 = vld [vmem:[%s5132_s2 + $0x68] sm:$0xff]  ;;  %v4693_v43 = vpack.c.bf16 %v49_v40, %v48_v39  ;;  %v50_v45 = vld [vmem:[%s5132_s2 + $0x50] sm:$0xff] }
  0x12   :  { %4320 = vmatprep.subr.bf16.mxu1 %v4496_v3  ;;  %v4697_v44 = vpack.c.bf16 %v53_v42, %v52_v41  ;;  %v51_v46 = vld [vmem:[%s5132_s2 + $0x58] sm:$0xff]  ;;  %v54_v47 = vld [vmem:[%s5132_s2 + $0x70] sm:$0xff]  ;;  %v56_v51 = vld [vmem:[%s5133_s3] sm:$0xff] }
  0x13   :  { %3937 = vmatmul.mubr.msk.f32.vlgmr.msra.gmra.mrb[2].mxu0 %vm83_vm1, %v4595_v18  ;;  %v55_v48 = vld [vmem:[%s5132_s2 + $0x78] sm:$0xff]  ;;  %v4717_v49 = vpack.c.bf16 %v51_v46, %v50_v45  ;;  %v57_v52 = vld [vmem:[%s5133_s3 + $0x8] sm:$0xff]  ;;  %v60_v53 = vld [vmem:[%s5133_s3 + $0x20] sm:$0xff] }
  0x14   :  { %3948 = vmatmul.mubr.msk.f32.vlgmr.msra.gmra.mrb[2].mxu1 %vm83_vm1, %v4595_v18  ;;  %4316 = vmatpush3.bf16.msra.mxu0 %v4645_v31  ;;  %v4721_v50 = vpack.c.bf16 %v55_v48, %v54_v47  ;;  %v61_v54 = vld [vmem:[%s5133_s3 + $0x28] sm:$0xff]  ;;  %v4741_v55 = vpack.c.bf16 %v57_v52, %v56_v51  ;;  %v58_v57 = vld [vmem:[%s5133_s3 + $0x10] sm:$0xff]  ;;  %v59_v58 = vld [vmem:[%s5133_s3 + $0x18] sm:$0xff] }
  0x15   :  { %4322 = vmatpush3.bf16.msra.mxu1 %v4649_v32  ;;  %4317 = vmatprep.subr.bf16.mxu0 %v4496_v3  ;;  %v4745_v56 = vpack.c.bf16 %v61_v54, %v60_v53  ;;  %v62_v59 = vld [vmem:[%s5133_s3 + $0x30] sm:$0xff]  ;;  %v4769_v60 = vpack.c.bf16 %v59_v58, %v58_v57  ;;  %v63_v61 = vld [vmem:[%s5133_s3 + $0x38] sm:$0xff]  ;;  %v64_v63 = vld [vmem:[%s5133_s3 + $0x40] sm:$0xff]  ;;  %v77_v53 = vlaneseq }
  0x16   :  { %4323 = vmatprep.subr.bf16.mxu1 %v4496_v3  ;;  %3958 = vmatprep.mubr.msk.f32.mxu0 %vm4497_vm0, %v4498_v11  ;;  %v4774_v62 = vpack.c.bf16 %v63_v61, %v62_v59  ;;  %v65_v0 = vld [vmem:[%s5133_s3 + $0x48] sm:$0xff]  ;;  %v68_v1 = vld [vmem:[%s5133_s3 + $0x60] sm:$0xff]  ;;  %v66_v7 = vld [vmem:[%s5133_s3 + $0x50] sm:$0xff] }
  0x17   :  { %3969 = vmatprep.mubr.msk.f32.mxu1 %vm4497_vm0, %v4498_v11  ;;  %v4788_v2 = vpack.c.bf16 %v65_v0, %v64_v63  ;;  %v69_v5 = vld [vmem:[%s5133_s3 + $0x68] sm:$0xff]  ;;  %v67_v9 = vld [vmem:[%s5133_s3 + $0x58] sm:$0xff]  ;;  %v70_v10 = vld [vmem:[%s5133_s3 + $0x70] sm:$0xff]  ;;  %v78_v54 = vshrl.u32 %v77_v53, 7  ;;  %v80_v57 = vand.u32 127, %v77_v53 }
  0x18   :  { %4319 = vmatpush3.bf16.msra.mxu0 %v4669_v37  ;;  %v4794_v6 = vpack.c.bf16 %v69_v5, %v68_v1  ;;  %v4813_v14 = vpack.c.bf16 %v67_v9, %v66_v7  ;;  %v71_v15 = vld [vmem:[%s5133_s3 + $0x78] sm:$0xff] }
  0x19   :  { %4325 = vmatpush3.bf16.msra.mxu1 %v4673_v38  ;;  %4326 = vmatprep.subr.bf16.mxu0 %v4496_v3  ;;  %v4820_v16 = vpack.c.bf16 %v71_v15, %v70_v10  ;;  %vm4862_vm3 = vcmp.le.s32.totalorder %v80_v57, %v78_v54 }
  0x1a   :  { %4332 = vmatprep.subr.bf16.mxu1 %v4496_v3 }
  0x1b   :  { %3959 = vmatmul.mubr.msk.f32.vlgmr.msra.gmra.mrb[4].mxu0 %vm83_vm1, %v4595_v18 }
  0x1c   :  { %3970 = vmatmul.mubr.msk.f32.vlgmr.msra.gmra.mrb[4].mxu1 %vm83_vm1, %v4595_v18  ;;  %4328 = vmatpush3.bf16.msra.mxu0 %v4693_v43 }
  0x1d   :  { %4334 = vmatpush3.bf16.msra.mxu1 %v4697_v44  ;;  %4329 = vmatprep.subr.bf16.mxu0 %v4496_v3 }
  0x1e   :  { %4335 = vmatprep.subr.bf16.mxu1 %v4496_v3  ;;  %3980 = vmatprep.mubr.msk.f32.mxu0 %vm4497_vm0, %v4498_v11 }
  0x1f   :  { %3991 = vmatprep.mubr.msk.f32.mxu1 %vm4497_vm0, %v4498_v11 }
  0x20   :  { %4331 = vmatpush3.bf16.msra.mxu0 %v4717_v49 }
  0x21   :  { %4337 = vmatpush3.bf16.msra.mxu1 %v4721_v50  ;;  %4338 = vmatprep.subr.bf16.mxu0 %v4496_v3 }
  0x22   :  { %4344 = vmatprep.subr.bf16.mxu1 %v4496_v3 }
  0x23   :  { %3981 = vmatmul.mubr.msk.f32.vlgmr.msra.gmra.mrb[6].mxu0 %vm83_vm1, %v4595_v18 }
  0x24   :  { %3992 = vmatmul.mubr.msk.f32.vlgmr.msra.gmra.mrb[6].mxu1 %vm83_vm1, %v4595_v18  ;;  %4340 = vmatpush3.bf16.msra.mxu0 %v4741_v55 }
  0x25   :  { %4346 = vmatpush3.bf16.msra.mxu1 %v4745_v56  ;;  %4341 = vmatprep.subr.bf16.mxu0 %v4496_v3 }
  0x26   :  { %4347 = vmatprep.subr.bf16.mxu1 %v4496_v3  ;;  %4002 = vmatprep.mubr.msk.f32.mxu0 %vm4497_vm0, %v4498_v11 }
  0x27   :  { %4013 = vmatprep.mubr.msk.f32.mxu1 %vm4497_vm0, %v4498_v11 }
  0x28   :  { %4343 = vmatpush3.bf16.msra.mxu0 %v4769_v60 }
  0x29   :  { %4349 = vmatpush3.bf16.msra.mxu1 %v4774_v62  ;;  %4350 = vmatprep.subr.bf16.mxu0 %v4496_v3 }
  0x2a   :  { %4356 = vmatprep.subr.bf16.mxu1 %v4496_v3 }
  0x2b   :  { %4003 = vmatmul.mubr.msk.f32.vlgmr.msra.gmra.mrb[8].mxu0 %vm83_vm1, %v4595_v18 }
  0x2c   :  { %4014 = vmatmul.mubr.msk.f32.vlgmr.msra.gmra.mrb[8].mxu1 %vm83_vm1, %v4595_v18  ;;  %4352 = vmatpush3.bf16.msra.mxu0 %v4788_v2 }
  0x2d   :  { %4358 = vmatpush3.bf16.msra.mxu1 %v4794_v6  ;;  %4353 = vmatprep.subr.bf16.mxu0 %v4496_v3 }
  0x2e   :  { %4359 = vmatprep.subr.bf16.mxu1 %v4496_v3  ;;  %4024 = vmatprep.mubr.msk.f32.mxu0 %vm4497_vm0, %v4498_v11 }
  0x2f   :  { %4035 = vmatprep.mubr.msk.f32.mxu1 %vm4497_vm0, %v4498_v11 }
  0x30   :  { %4355 = vmatpush3.bf16.msra.mxu0 %v4813_v14 }
  0x31   :  { %4361 = vmatpush3.bf16.msra.mxu1 %v4820_v16  ;;  %4038 = vmatprep.subr.mxu0 %v4498_v11 }
  0x32   :  { %4043 = vmatprep.subr.mxu1 %v4498_v11 }
  0x33   :  { %4025 = vmatmul.mubr.msk.f32.vlgmr.msra.gmra.mrb[10].mxu0 %vm83_vm1, %v4595_v18 }
  0x34   :  { %4036 = vmatmul.mubr.msk.f32.vlgmr.msra.gmra.mrb[10].mxu1 %vm83_vm1, %v4595_v18  ;;  %4040 = vmatprep.mubr.msk.f32.mxu0 %vm4497_vm0, %v4498_v11 }
  0x35   :  { %4045 = vmatprep.mubr.msk.f32.mxu1 %vm4497_vm0, %v4498_v11 }
  0xde   :  { %v153_v17 = vpop.f32.mrb[0].mxu0 }
  0xdf   :  { %v3916_v21 = vpop.f32.mrb[1].mxu0  ;;  %v223_v22 = vpop.f32.mrb[0].mxu1 }
  0xe0   :  { %v3927_v23 = vpop.f32.mrb[1].mxu1 }
  0xe6   :  { %v293_v24 = vpop.f32.mrb[2].mxu0 }
  0xe7   :  { %v3938_v27 = vpop.f32.mrb[3].mxu0  ;;  %v363_v28 = vpop.f32.mrb[2].mxu1 }
  0xe8   :  { %v3949_v29 = vpop.f32.mrb[3].mxu1 }
  0xee   :  { %v433_v30 = vpop.f32.mrb[4].mxu0 }
  0xef   :  { %v503_v33 = vpop.f32.mrb[4].mxu1  ;;  %v3960_v34 = vpop.f32.mrb[5].mxu0  ;;  %4039 = vmatpush3.xpose.msk.msra.mxu0 %vm927_vm2, %v433_v30 }
  0xf0   :  { %4044 = vmatpush3.xpose.msk.msra.mxu1 %vm927_vm2, %v503_v33  ;;  %v3971_v18 = vpop.f32.mrb[5].mxu1  ;;  %4048 = vmatprep.subr.mxu0 %v4498_v11 }
  0xf1   :  { %4053 = vmatprep.subr.mxu1 %v4498_v11 }
  0xf2   :  { %4041 = vmatmul.mubr.msk.f32.vlgmr.msra.gmra.mrb[12].mxu0 %vm927_vm2, %v153_v17 }
  0xf3   :  { %4046 = vmatmul.mubr.msk.f32.vlgmr.msra.gmra.mrb[12].mxu1 %vm927_vm2, %v223_v22  ;;  %4050 = vmatprep.mubr.msk.f32.mxu0 %vm4497_vm0, %v4498_v11 }
  0xf4   :  { %4055 = vmatprep.mubr.msk.f32.mxu1 %vm4497_vm0, %v4498_v11 }
  0xf6   :  { %v573_v35 = vpop.f32.mrb[6].mxu0 }
  0xf7   :  { %v643_v36 = vpop.f32.mrb[6].mxu1  ;;  %v3982_v39 = vpop.f32.mrb[7].mxu0  ;;  %4049 = vmatpush3.xpose.msk.msra.mxu0 %vm927_vm2, %v573_v35 }
  0xf8   :  { %4054 = vmatpush3.xpose.msk.msra.mxu1 %vm927_vm2, %v643_v36  ;;  %v3993_v40 = vpop.f32.mrb[7].mxu1  ;;  %4058 = vmatprep.subr.mxu0 %v4498_v11 }
  0xf9   :  { %4063 = vmatprep.subr.mxu1 %v4498_v11 }
  0xfa   :  { %4051 = vmatmul.mubr.msk.f32.vlgmr.msra.gmra.mrb[14].mxu0 %vm927_vm2, %v293_v24 }
  0xfb   :  { %4056 = vmatmul.mubr.msk.f32.vlgmr.msra.gmra.mrb[14].mxu1 %vm927_vm2, %v363_v28  ;;  %4060 = vmatprep.mubr.msk.f32.mxu0 %vm4497_vm0, %v4498_v11 }
  0xfc   :  { %4065 = vmatprep.mubr.msk.f32.mxu1 %vm4497_vm0, %v4498_v11 }
  0xfe   :  { %v713_v41 = vpop.f32.mrb[8].mxu0 }
  0xff   :  { %v4004_v42 = vpop.f32.mrb[9].mxu0  ;;  %4059 = vmatpush3.msra.mxu0 %v713_v41  ;;  %v783_v45 = vpop.f32.mrb[8].mxu1 }
 0x100   :  { %v4015_v46 = vpop.f32.mrb[9].mxu1  ;;  %4064 = vmatpush3.msra.mxu1 %v783_v45  ;;  %4068 = vmatprep.subr.mxu0 %v4498_v11 }
 0x101   :  { %4073 = vmatprep.subr.mxu1 %v4498_v11 }
 0x106   :  { %v4858_v47 = vpop.f32.mrb[10].mxu0 }
 0x107   :  { %v4860_v48 = vpop.f32.mrb[10].mxu1  ;;  %v4026_v51 = vpop.f32.mrb[11].mxu0 }
 0x108   :  { %v4037_v52 = vpop.f32.mrb[11].mxu1 }
 0x1c5   :  { %v1000_v59 = vpop.f32.mrb[12].mxu0 }
 0x1c6   :  { %v1234_v61 = vsel %vm4862_vm3, %v1000_v59, -1e+30  ;;  %v1076_v63 = vpop.f32.mrb[12].mxu1  ;;  %v4042_v0 = vpop.f32.mrb[13].mxu0 }
 0x1c7   :  { %v4047_v1 = vpop.f32.mrb[13].mxu1  ;;  %v1238_v5 = vsel %vm927_vm2, %v1234_v61, -inf  ;;  %v1235_v7 = vsel %vm4862_vm3, %v1076_v63, -1e+30 }
 0x1c8   :  { %1239 = vmax.xlane.f32.xlu0 %v1238_v5  ;;  %v1241_v9 = vsel %vm927_vm2, %v1235_v7, -inf }
 0x1cc   :  { %1242 = vmax.xlane.f32.xlu0 %v1241_v9 }
 0x1cd   :  { %v1152_v10 = vpop.f32.mrb[14].mxu0 }
 0x1ce   :  { %v1236_v15 = vsel %vm4862_vm3, %v1152_v10, -1e+30  ;;  %v1228_v17 = vpop.f32.mrb[14].mxu1  ;;  %v4052_v21 = vpop.f32.mrb[15].mxu0 }
 0x1cf   :  { %v4057_v22 = vpop.f32.mrb[15].mxu1  ;;  %v1244_v23 = vsel %vm927_vm2, %v1236_v15, -inf  ;;  %v1237_v24 = vsel %vm4862_vm3, %v1228_v17, -1e+30 }
 0x1d0   :  { %1245 = vmax.xlane.f32.xlu1 %v1244_v23  ;;  %v1247_v27 = vsel %vm927_vm2, %v1237_v24, -inf  ;;  %v4908_v22 = vld [vmem:[%s5134_s4 + $0x8] sm:$0xff]  ;;  %v4915_v23 = vld [vmem:[%s5134_s4 + $0x10] sm:$0xff] }
 0x1d4   :  { %1248 = vmax.xlane.f32.xlu1 %v1247_v27 }
 0x255   :  { %v1240_v28 = vpop.xlane.xlu0 %1239 }
 0x256   :  { %v1250_v29 = vsub.f32 %v1234_v61, %v1240_v28  ;;  %v4925_v28 = vld [vmem:[%s5134_s4 + $0x18] sm:$0xff] }
 0x258   :  { %v1254_v30 = vmul.f32 1.442695, %v1250_v29 }
 0x259   :  { %v1243_v33 = vpop.xlane.xlu0 %1242 }
 0x25a   :  { %4440 = vpow2.f32 %v1254_v30  ;;  %v1251_v34 = vsub.f32 %v1235_v7, %v1243_v33 }
 0x25c   :  { %v1256_v18 = vmul.f32 1.442695, %v1251_v34 }
 0x25d   :  { %v1246_v35 = vpop.xlane.xlu1 %1245 }
 0x25e   :  { %4442 = vpow2.f32 %v1256_v18  ;;  %v1252_v36 = vsub.f32 %v1236_v15, %v1246_v35 }
 0x260   :  { %v1258_v39 = vmul.f32 1.442695, %v1252_v36  ;;  %v4943_v36 = vld [vmem:[%s5130_s0 + $0x8] sm:$0xff] }
 0x261   :  { %v1249_v40 = vpop.xlane.xlu1 %1248 }
 0x262   :  { %4444 = vpow2.f32 %v1258_v39  ;;  %v1253_v41 = vsub.f32 %v1237_v24, %v1249_v40 }
 0x264   :  { %v4441_v42 = vpop.eup %4440  ;;  %v1260_v45 = vmul.f32 1.442695, %v1253_v41 }
 0x265   :  { %v1262_v46 = vsel %vm927_vm2, %v4441_v42, 0.0 }
 0x266   :  { %4446 = vpow2.f32 %v1260_v45  ;;  %1263 = vadd.xlane.f32.xlu0 %v1262_v46 }
 0x268   :  { %v4443_v51 = vpop.eup %4442 }
 0x269   :  { %v1265_v52 = vsel %vm927_vm2, %v4443_v51, 0.0 }
 0x26a   :  { %1266 = vadd.xlane.f32.xlu1 %v1265_v52 }
 0x26c   :  { %v4445_v53 = vpop.eup %4444 }
 0x26d   :  { %v1268_v54 = vsel %vm927_vm2, %v4445_v53, 0.0 }
 0x26e   :  { %1269 = vadd.xlane.f32.xlu0 %v1268_v54 }
 0x270   :  { %v4447_v57 = vpop.eup %4446 }
 0x271   :  { %v1271_v59 = vsel %vm927_vm2, %v4447_v57, 0.0 }
 0x272   :  { %1272 = vadd.xlane.f32.xlu1 %v1271_v59 }
 0x2f3   :  { %v1264_v61 = vpop.xlane.xlu0 %1263 }
 0x2f4   :  { %4448 = vrcp.f32 %v1264_v61 }
 0x2f7   :  { %v1267_v63 = vpop.xlane.xlu1 %1266 }
 0x2f8   :  { %4450 = vrcp.f32 %v1267_v63 }
 0x2fb   :  { %v1270_v0 = vpop.xlane.xlu0 %1269 }
 0x2fc   :  { %4452 = vrcp.f32 %v1270_v0 }
 0x2fe   :  { %v4449_v1 = vpop.eup %4448 }
 0x2ff   :  { %v1278_v5 = vmul.f32 %v4449_v1, %v4441_v42  ;;  %v1273_v7 = vpop.xlane.xlu1 %1272 }
 0x300   :  { %4454 = vrcp.f32 %v1273_v7 }
 0x301   :  { %4061 = vmatmul.mubr.msk.f32.vlgmr.msra.gmra.mrb[16].mxu0 %vm927_vm2, %v1278_v5 }
 0x302   :  { %v4451_v9 = vpop.eup %4450  ;;  %4069 = vmatpush3.msra.mxu0 %v4858_v47  ;;  %4070 = vmatprep.mubr.msk.f32.mxu0 %vm4497_vm0, %v4498_v11 }
 0x303   :  { %v1279_v10 = vmul.f32 %v4451_v9, %v4443_v51  ;;  %4078 = vmatprep.subr.mxu0 %v4498_v11 }
 0x305   :  { %4066 = vmatmul.mubr.msk.f32.vlgmr.msra.gmra.mrb[16].mxu1 %vm927_vm2, %v1279_v10 }
 0x306   :  { %v4453_v15 = vpop.eup %4452  ;;  %4074 = vmatpush3.msra.mxu1 %v4860_v48  ;;  %4075 = vmatprep.mubr.msk.f32.mxu1 %vm4497_vm0, %v4498_v11  ;;  %v4901_v48 = vld [vmem:[%s5134_s4] sm:$0xff] }
 0x307   :  { %v1280_v17 = vmul.f32 %v4453_v15, %v4445_v53  ;;  %4083 = vmatprep.subr.mxu1 %v4498_v11 }
 0x309   :  { %4071 = vmatmul.mubr.msk.f32.vlgmr.msra.gmra.mrb[18].mxu0 %vm927_vm2, %v1280_v17 }
 0x30a   :  { %v4455_v47 = vpop.eup %4454  ;;  %4080 = vmatprep.mubr.msk.f32.mxu0 %vm4497_vm0, %v4498_v11  ;;  %4079 = vmatpush3.msra.mxu0 %v4901_v48 }
 0x30b   :  { %v1281_v21 = vmul.f32 %v4455_v47, %v4447_v57  ;;  %4088 = vmatprep.subr.mxu0 %v4498_v11 }
 0x30d   :  { %4076 = vmatmul.mubr.msk.f32.vlgmr.msra.gmra.mrb[18].mxu1 %vm927_vm2, %v1281_v21 }
 0x30e   :  { %4085 = vmatprep.mubr.msk.f32.mxu1 %vm4497_vm0, %v4498_v11  ;;  %4084 = vmatpush3.msra.mxu1 %v4908_v22 }
 0x30f   :  { %4093 = vmatprep.subr.mxu1 %v4498_v11 }
 0x3d4   :  { %v1351_v24 = vpop.f32.mrb[16].mxu0 }
 0x3d5   :  { %v4062_v27 = vpop.f32.mrb[17].mxu0  ;;  %4081 = vmatmul.mubr.msk.f32.vlgmr.msra.gmra.mrb[20].mxu0 %vm927_vm2, %v1351_v24 }
 0x3d6   :  { %4089 = vmatpush3.msra.mxu0 %v4915_v23  ;;  %4090 = vmatprep.mubr.msk.f32.mxu0 %vm4497_vm0, %v4498_v11 }
 0x3d7   :  { %4362 = vmatprep.subr.bf16.mxu0 %v4496_v3 }
 0x3d8   :  { %v1424_v29 = vpop.f32.mrb[16].mxu1 }
 0x3d9   :  { %v4067_v30 = vpop.f32.mrb[17].mxu1  ;;  %4086 = vmatmul.mubr.msk.f32.vlgmr.msra.gmra.mrb[20].mxu1 %vm927_vm2, %v1424_v29 }
 0x3da   :  { %4094 = vmatpush3.msra.mxu1 %v4925_v28  ;;  %4095 = vmatprep.mubr.msk.f32.mxu1 %vm4497_vm0, %v4498_v11 }
 0x3db   :  { %4368 = vmatprep.subr.bf16.mxu1 %v4496_v3 }
 0x3dc   :  { %v1497_v33 = vpop.f32.mrb[18].mxu0 }
 0x3dd   :  { %v4072_v34 = vpop.f32.mrb[19].mxu0  ;;  %4091 = vmatmul.mubr.msk.f32.vlgmr.msra.gmra.mrb[22].mxu0 %vm927_vm2, %v1497_v33 }
 0x3de   :  { %4364 = vmatpush3.bf16.msra.mxu0 %v4548_v4  ;;  %4106 = vmatprep.mubr.msk.f32.mxu0 %vm4497_vm0, %v4498_v11 }
 0x3df   :  { %4365 = vmatprep.subr.bf16.mxu0 %v4496_v3 }
 0x3e0   :  { %v1570_v18 = vpop.f32.mrb[18].mxu1 }
 0x3e1   :  { %v4077_v35 = vpop.f32.mrb[19].mxu1  ;;  %4096 = vmatmul.mubr.msk.f32.vlgmr.msra.gmra.mrb[22].mxu1 %vm927_vm2, %v1570_v18 }
 0x3e2   :  { %4367 = vmatpush3.bf16.msra.mxu0 %v4572_v12  ;;  %4370 = vmatpush3.bf16.msra.mxu1 %v4559_v8 }
 0x3e3   :  { %4371 = vmatprep.subr.bf16.mxu1 %v4496_v3  ;;  %4374 = vmatprep.subr.bf16.mxu0 %v4496_v3 }
 0x3e4   :  { %4117 = vmatprep.mubr.msk.f32.mxu1 %vm4497_vm0, %v4498_v11 }
 0x3e5   :  { %4107 = vmatmul.mubr.msk.f32.vlgmr.msra.gmra.mrb[24].mxu0 %vm83_vm1, %v4943_v36 }
 0x3e6   :  { %4373 = vmatpush3.bf16.msra.mxu1 %v4576_v13  ;;  %4376 = vmatpush3.bf16.msra.mxu0 %v4597_v19 }
 0x3e7   :  { %4377 = vmatprep.subr.bf16.mxu0 %v4496_v3  ;;  %4380 = vmatprep.subr.bf16.mxu1 %v4496_v3 }
 0x3e8   :  { %4128 = vmatprep.mubr.msk.f32.mxu0 %vm4497_vm0, %v4498_v11 }
 0x3e9   :  { %4118 = vmatmul.mubr.msk.f32.vlgmr.msra.gmra.mrb[24].mxu1 %vm83_vm1, %v4943_v36 }
 0x3ea   :  { %4379 = vmatpush3.bf16.msra.mxu0 %v4621_v25  ;;  %4382 = vmatpush3.bf16.msra.mxu1 %v4601_v20 }
 0x3eb   :  { %4383 = vmatprep.subr.bf16.mxu1 %v4496_v3  ;;  %4386 = vmatprep.subr.bf16.mxu0 %v4496_v3 }
 0x3ec   :  { %4139 = vmatprep.mubr.msk.f32.mxu1 %vm4497_vm0, %v4498_v11 }
 0x3ed   :  { %4129 = vmatmul.mubr.msk.f32.vlgmr.msra.gmra.mrb[26].mxu0 %vm83_vm1, %v4943_v36 }
 0x3ee   :  { %4385 = vmatpush3.bf16.msra.mxu1 %v4625_v26  ;;  %4388 = vmatpush3.bf16.msra.mxu0 %v4645_v31  ;;  %v5042_v26 = vld [vmem:[%s5135_s5] ss:$0 sm:$0xff]  ;;  %s4499_s5 = smov [#allocation2]  }
 0x3ef   :  { %4389 = vmatprep.subr.bf16.mxu0 %v4496_v3  ;;  %4392 = vmatprep.subr.bf16.mxu1 %v4496_v3  ;;  %s3669_s27 = sshll.u32 %s4499_s5, 4  ;;  %s3670_s27 = int_to_ptr.vmem [resolvable:$true] %s3669_s27 }
 0x3f0   :  { %4150 = vmatprep.mubr.msk.f32.mxu0 %vm4497_vm0, %v4498_v11  ;;  %s4472_s28 = scalar_lea.vmem %s3670_s27, 256  ;;  %p4477_p1 = scmp.lt.s32.totalorder %s3670_s27, %s3670_s27 }
 0x3f1   :  { %4140 = vmatmul.mubr.msk.f32.vlgmr.msra.gmra.mrb[26].mxu1 %vm83_vm1, %v4943_v36  ;;  %p4473_p0 = scmp.ne.s32.totalorder %s3670_s27, %s4472_s28  ;;  %p4478_p2 = scmp.lt.s32.totalorder %s4472_s28, %s4472_s28 }
 0x3f2   :  { %4391 = vmatpush3.bf16.msra.mxu0 %v4669_v37  ;;  %4394 = vmatpush3.bf16.msra.mxu1 %v4649_v32 }
 0x3f3   :  { %4395 = vmatprep.subr.bf16.mxu1 %v4496_v3  ;;  %4398 = vmatprep.subr.bf16.mxu0 %v4496_v3  ;;  %p4479_p3 = por %p4478_p2, %p4477_p1 }
 0x3f4   :  { %4161 = vmatprep.mubr.msk.f32.mxu1 %vm4497_vm0, %v4498_v11 }
 0x3f5   :  { %4151 = vmatmul.mubr.msk.f32.vlgmr.msra.gmra.mrb[28].mxu0 %vm83_vm1, %v4943_v36  ;;  %p4480_p4 = pnand %p4479_p3, %p4473_p0 }
 0x3f6   :  { %4397 = vmatpush3.bf16.msra.mxu1 %v4673_v38  ;;  %4400 = vmatpush3.bf16.msra.mxu0 %v4693_v43 }
 0x3f7   :  { %4401 = vmatprep.subr.bf16.mxu0 %v4496_v3  ;;  %4404 = vmatprep.subr.bf16.mxu1 %v4496_v3 }
 0x3f8   :  { %4172 = vmatprep.mubr.msk.f32.mxu0 %vm4497_vm0, %v4498_v11 }
 0x3f9   :  { %4162 = vmatmul.mubr.msk.f32.vlgmr.msra.gmra.mrb[28].mxu1 %vm83_vm1, %v4943_v36 }
 0x3fa   :  { %4403 = vmatpush3.bf16.msra.mxu0 %v4717_v49  ;;  %4406 = vmatpush3.bf16.msra.mxu1 %v4697_v44 }
 0x3fb   :  { %4407 = vmatprep.subr.bf16.mxu1 %v4496_v3  ;;  %4183 = vmatprep.mubr.msk.f32.mxu1 %vm4497_vm0, %v4498_v11 }
 0x3fc   :  { %4410 = vmatprep.subr.bf16.mxu0 %v4496_v3 }
 0x3fd   :  { %4173 = vmatmul.mubr.msk.f32.vlgmr.msra.gmra.mrb[30].mxu0 %vm83_vm1, %v4943_v36 }
 0x3fe   :  { %4409 = vmatpush3.bf16.msra.mxu1 %v4721_v50  ;;  %4412 = vmatpush3.bf16.msra.mxu0 %v4741_v55 }
 0x3ff   :  { %4413 = vmatprep.subr.bf16.mxu0 %v4496_v3  ;;  %4416 = vmatprep.subr.bf16.mxu1 %v4496_v3 }
 0x400   :  { %4194 = vmatprep.mubr.msk.f32.mxu0 %vm4497_vm0, %v4498_v11 }
 0x401   :  { %4184 = vmatmul.mubr.msk.f32.vlgmr.msra.gmra.mrb[30].mxu1 %vm83_vm1, %v4943_v36 }
 0x402   :  { %4415 = vmatpush3.bf16.msra.mxu0 %v4769_v60  ;;  %4418 = vmatpush3.bf16.msra.mxu1 %v4745_v56 }
 0x403   :  { %4419 = vmatprep.subr.bf16.mxu1 %v4496_v3  ;;  %4422 = vmatprep.subr.bf16.mxu0 %v4496_v3 }
 0x404   :  { %4205 = vmatprep.mubr.msk.f32.mxu1 %vm4497_vm0, %v4498_v11 }
 0x405   :  { %4195 = vmatmul.mubr.msk.f32.vlgmr.msra.gmra.mrb[32].mxu0 %vm83_vm1, %v4943_v36 }
 0x406   :  { %4421 = vmatpush3.bf16.msra.mxu1 %v4774_v62  ;;  %4424 = vmatpush3.bf16.msra.mxu0 %v4788_v2 }
 0x407   :  { %4425 = vmatprep.subr.bf16.mxu0 %v4496_v3  ;;  %4428 = vmatprep.subr.bf16.mxu1 %v4496_v3 }
 0x408   :  { %4216 = vmatprep.mubr.msk.f32.mxu0 %vm4497_vm0, %v4498_v11 }
 0x409   :  { %4206 = vmatmul.mubr.msk.f32.vlgmr.msra.gmra.mrb[32].mxu1 %vm83_vm1, %v4943_v36 }
 0x40a   :  { %4427 = vmatpush3.bf16.msra.mxu0 %v4813_v14  ;;  %4430 = vmatpush3.bf16.msra.mxu1 %v4794_v6 }
 0x40b   :  { %4431 = vmatprep.subr.bf16.mxu1 %v4496_v3  ;;  %4230 = vmatprep.subr.mxu0 %v4498_v11 }
 0x40c   :  { %4227 = vmatprep.mubr.msk.f32.mxu1 %vm4497_vm0, %v4498_v11 }
 0x40d   :  { %4217 = vmatmul.mubr.msk.f32.vlgmr.msra.gmra.mrb[34].mxu0 %vm83_vm1, %v4943_v36 }
 0x40e   :  { %4433 = vmatpush3.bf16.msra.mxu1 %v4820_v16  ;;  %4232 = vmatprep.mubr.msk.f32.mxu0 %vm4497_vm0, %v4498_v11 }
 0x40f   :  { %4235 = vmatprep.subr.mxu1 %v4498_v11 }
 0x411   :  { %4228 = vmatmul.mubr.msk.f32.vlgmr.msra.gmra.mrb[34].mxu1 %vm83_vm1, %v4943_v36 }
 0x412   :  { %4237 = vmatprep.mubr.msk.f32.mxu1 %vm4497_vm0, %v4498_v11 }
 0x4a8   :  { %v1643_v3 = vpop.f32.mrb[20].mxu0 }
 0x4a9   :  { %v4082_v4 = vpop.f32.mrb[21].mxu0 }
 0x4ac   :  { %v1716_v8 = vpop.f32.mrb[20].mxu1 }
 0x4ad   :  { %v1866_v12 = vadd.f32 %v1716_v8, %v1643_v3  ;;  %v4087_v13 = vpop.f32.mrb[21].mxu1 }
 0x4b0   :  { %v1789_v19 = vpop.f32.mrb[22].mxu0 }
 0x4b1   :  { %v1867_v20 = vadd.f32 %v1866_v12, %v1789_v19  ;;  %v4092_v25 = vpop.f32.mrb[23].mxu0 }
 0x4b4   :  { %v1862_v31 = vpop.f32.mrb[22].mxu1 }
 0x4b5   :  { %v1868_v32 = vadd.f32 %v1867_v20, %v1862_v31  ;;  %v4097_v37 = vpop.f32.mrb[23].mxu1 }
 0x4b7   :  { %v1875_v38 = vadd.f32 %v5042_v26, %v1868_v32 }
 0x4b8   :  { %v1948_v43 = vpop.f32.mrb[24].mxu0 }
 0x4b9   :  { %1876 = vst [vmem:[#allocation2] sm:$0xff] %v1875_v38  ;;  %v4108_v44 = vpop.f32.mrb[25].mxu0 }
 0x4bc   :  { %v2018_v49 = vpop.f32.mrb[24].mxu1 }
 0x4bd   :  { %v4119_v50 = vpop.f32.mrb[25].mxu1 }
 0x4c0   :  { %v2088_v55 = vpop.f32.mrb[26].mxu0 }
 0x4c1   :  { %v4130_v56 = vpop.f32.mrb[27].mxu0 }
 0x4c4   :  { %v2158_v60 = vpop.f32.mrb[26].mxu1 }
 0x4c5   :  { %v4141_v62 = vpop.f32.mrb[27].mxu1 }
 0x4c8   :  { %v2228_v2 = vpop.f32.mrb[28].mxu0 }
 0x4c9   :  { %4231 = vmatpush3.xpose.msk.msra.mxu0 %vm927_vm2, %v2228_v2  ;;  %v4152_v6 = vpop.f32.mrb[29].mxu0 }
 0x4ca   :  { %4240 = vmatprep.subr.mxu0 %v4498_v11 }
 0x4cc   :  { %v2298_v14 = vpop.f32.mrb[28].mxu1  ;;  %4233 = vmatmul.mubr.msk.f32.vlgmr.msra.gmra.mrb[36].mxu0 %vm927_vm2, %v1948_v43 }
 0x4cd   :  { %v4163_v16 = vpop.f32.mrb[29].mxu1  ;;  %4236 = vmatpush3.xpose.msk.msra.mxu1 %vm927_vm2, %v2298_v14  ;;  %4242 = vmatprep.mubr.msk.f32.mxu0 %vm4497_vm0, %v4498_v11 }
 0x4ce   :  { %4245 = vmatprep.subr.mxu1 %v4498_v11 }
 0x4d0   :  { %v2368_v39 = vpop.f32.mrb[30].mxu0  ;;  %4238 = vmatmul.mubr.msk.f32.vlgmr.msra.gmra.mrb[36].mxu1 %vm927_vm2, %v2018_v49 }
 0x4d1   :  { %4241 = vmatpush3.xpose.msk.msra.mxu0 %vm927_vm2, %v2368_v39  ;;  %v4174_v40 = vpop.f32.mrb[31].mxu0  ;;  %4247 = vmatprep.mubr.msk.f32.mxu1 %vm4497_vm0, %v4498_v11 }
 0x4d2   :  { %4250 = vmatprep.subr.mxu0 %v4498_v11 }
 0x4d4   :  { %v2438_v41 = vpop.f32.mrb[30].mxu1  ;;  %4243 = vmatmul.mubr.msk.f32.vlgmr.msra.gmra.mrb[38].mxu0 %vm927_vm2, %v2088_v55 }
 0x4d5   :  { %v4185_v42 = vpop.f32.mrb[31].mxu1  ;;  %4246 = vmatpush3.xpose.msk.msra.mxu1 %vm927_vm2, %v2438_v41  ;;  %4252 = vmatprep.mubr.msk.f32.mxu0 %vm4497_vm0, %v4498_v11 }
 0x4d6   :  { %4255 = vmatprep.subr.mxu1 %v4498_v11 }
 0x4d8   :  { %4248 = vmatmul.mubr.msk.f32.vlgmr.msra.gmra.mrb[38].mxu1 %vm927_vm2, %v2158_v60  ;;  %v2508_v45 = vpop.f32.mrb[32].mxu0 }
 0x4d9   :  { %v4196_v46 = vpop.f32.mrb[33].mxu0  ;;  %4251 = vmatpush3.msra.mxu0 %v2508_v45  ;;  %4257 = vmatprep.mubr.msk.f32.mxu1 %vm4497_vm0, %v4498_v11 }
 0x4da   :  { %4260 = vmatprep.subr.mxu0 %v4498_v11 }
 0x4dc   :  { %v2578_v51 = vpop.f32.mrb[32].mxu1 }
 0x4dd   :  { %v4207_v52 = vpop.f32.mrb[33].mxu1  ;;  %4256 = vmatpush3.msra.mxu1 %v2578_v51 }
 0x4de   :  { %4265 = vmatprep.subr.mxu1 %v4498_v11 }
 0x4e0   :  { %v5067_v53 = vpop.f32.mrb[34].mxu0 }
 0x4e1   :  { %v4218_v54 = vpop.f32.mrb[35].mxu0 }
 0x4e4   :  { %v5069_v57 = vpop.f32.mrb[34].mxu1 }
 0x4e5   :  { %v4229_v59 = vpop.f32.mrb[35].mxu1 }
 0x59f   :  { %v2794_v61 = vpop.f32.mrb[36].mxu0 }
 0x5a0   :  { %v3026_v63 = vsel %vm4862_vm3, %v2794_v61, -1e+30  ;;  %v4234_v0 = vpop.f32.mrb[37].mxu0 }
 0x5a1   :  { %v3030_v1 = vsel %vm927_vm2, %v3026_v63, -inf }
 0x5a2   :  { %3031 = vmax.xlane.f32.xlu0 %v3030_v1 }
 0x5a3   :  { %v2870_v5 = vpop.f32.mrb[36].mxu1 }
 0x5a4   :  { %v3027_v7 = vsel %vm4862_vm3, %v2870_v5, -1e+30  ;;  %v4239_v9 = vpop.f32.mrb[37].mxu1 }
 0x5a5   :  { %v3033_v10 = vsel %vm927_vm2, %v3027_v7, -inf }
 0x5a6   :  { %3034 = vmax.xlane.f32.xlu1 %v3033_v10 }
 0x5a7   :  { %v2946_v15 = vpop.f32.mrb[38].mxu0 }
 0x5a8   :  { %v3028_v17 = vsel %vm4862_vm3, %v2946_v15, -1e+30  ;;  %v4244_v47 = vpop.f32.mrb[39].mxu0 }
 0x5a9   :  { %v3036_v21 = vsel %vm927_vm2, %v3028_v17, -inf }
 0x5aa   :  { %3037 = vmax.xlane.f32.xlu0 %v3036_v21 }
 0x5ab   :  { %v3022_v24 = vpop.f32.mrb[38].mxu1 }
 0x5ac   :  { %v3029_v27 = vsel %vm4862_vm3, %v3022_v24, -1e+30  ;;  %v4249_v29 = vpop.f32.mrb[39].mxu1 }
 0x5ad   :  { %v3039_v30 = vsel %vm927_vm2, %v3029_v27, -inf }
 0x5ae   :  { %3040 = vmax.xlane.f32.xlu1 %v3039_v30 }
 0x62f   :  { %v3032_v33 = vpop.xlane.xlu0 %3031 }
 0x630   :  { %v3042_v34 = vsub.f32 %v3026_v63, %v3032_v33 }
 0x632   :  { %v3046_v18 = vmul.f32 1.442695, %v3042_v34 }
 0x633   :  { %v3035_v35 = vpop.xlane.xlu1 %3034 }
 0x634   :  { %4456 = vpow2.f32 %v3046_v18  ;;  %v3043_v36 = vsub.f32 %v3027_v7, %v3035_v35 }
 0x636   :  { %v3048_v3 = vmul.f32 1.442695, %v3043_v36 }
 0x637   :  { %v3038_v4 = vpop.xlane.xlu0 %3037 }
 0x638   :  { %4458 = vpow2.f32 %v3048_v3  ;;  %v3044_v8 = vsub.f32 %v3028_v17, %v3038_v4 }
 0x63a   :  { %v3050_v12 = vmul.f32 1.442695, %v3044_v8 }
 0x63b   :  { %v3041_v13 = vpop.xlane.xlu1 %3040 }
 0x63c   :  { %4460 = vpow2.f32 %v3050_v12  ;;  %v3045_v19 = vsub.f32 %v3029_v27, %v3041_v13 }
 0x63e   :  { %v4457_v58 = vpop.eup %4456  ;;  %v3052_v20 = vmul.f32 1.442695, %v3045_v19 }
 0x63f   :  { %v3054_v25 = vsel %vm927_vm2, %v4457_v58, 0.0 }
 0x640   :  { %4462 = vpow2.f32 %v3052_v20  ;;  %3055 = vadd.xlane.f32.xlu0 %v3054_v25 }
 0x642   :  { %v4459_v31 = vpop.eup %4458 }
 0x643   :  { %v3057_v32 = vsel %vm927_vm2, %v4459_v31, 0.0 }
 0x644   :  { %3058 = vadd.xlane.f32.xlu1 %v3057_v32 }
 0x646   :  { %v4461_v37 = vpop.eup %4460 }
 0x647   :  { %v3060_v38 = vsel %vm927_vm2, %v4461_v37, 0.0 }
 0x648   :  { %3061 = vadd.xlane.f32.xlu0 %v3060_v38 }
 0x64a   :  { %v4463_v43 = vpop.eup %4462 }
 0x64b   :  { %v3063_v44 = vsel %vm927_vm2, %v4463_v43, 0.0 }
 0x64c   :  { %3064 = vadd.xlane.f32.xlu1 %v3063_v44 }
 0x6cd   :  { %v3056_v49 = vpop.xlane.xlu0 %3055 }
 0x6ce   :  { %4464 = vrcp.f32 %v3056_v49 }
 0x6d1   :  { %v3059_v50 = vpop.xlane.xlu1 %3058 }
 0x6d2   :  { %4466 = vrcp.f32 %v3059_v50 }
 0x6d5   :  { %v3062_v55 = vpop.xlane.xlu0 %3061 }
 0x6d6   :  { %4468 = vrcp.f32 %v3062_v55 }
 0x6d8   :  { %v4465_v56 = vpop.eup %4464 }
 0x6d9   :  { %v3070_v60 = vmul.f32 %v4465_v56, %v4457_v58  ;;  %v3065_v62 = vpop.xlane.xlu1 %3064 }
 0x6da   :  { %4470 = vrcp.f32 %v3065_v62 }
 0x6db   :  { %4253 = vmatmul.mubr.msk.f32.vlgmr.msra.gmra.mrb[40].mxu0 %vm927_vm2, %v3070_v60 }
 0x6dc   :  { %v4467_v2 = vpop.eup %4466  ;;  %4261 = vmatpush3.msra.mxu0 %v5067_v53  ;;  %4262 = vmatprep.mubr.msk.f32.mxu0 %vm4497_vm0, %v4498_v11 }
 0x6dd   :  { %v3071_v6 = vmul.f32 %v4467_v2, %v4459_v31  ;;  %4270 = vmatprep.subr.mxu0 %v4498_v11 }
 0x6df   :  { %4258 = vmatmul.mubr.msk.f32.vlgmr.msra.gmra.mrb[40].mxu1 %vm927_vm2, %v3071_v6 }
 0x6e0   :  { %v4469_v14 = vpop.eup %4468  ;;  %4266 = vmatpush3.msra.mxu1 %v5069_v57  ;;  %4267 = vmatprep.mubr.msk.f32.mxu1 %vm4497_vm0, %v4498_v11 }
 0x6e1   :  { %v3072_v16 = vmul.f32 %v4469_v14, %v4461_v37  ;;  %4275 = vmatprep.subr.mxu1 %v4498_v11 }
 0x6e3   :  { %4263 = vmatmul.mubr.msk.f32.vlgmr.msra.gmra.mrb[42].mxu0 %vm927_vm2, %v3072_v16 }
 0x6e4   :  { %v4471_v39 = vpop.eup %4470  ;;  %4271 = vmatpush3.msra.mxu0 %v4901_v48  ;;  %4272 = vmatprep.mubr.msk.f32.mxu0 %vm4497_vm0, %v4498_v11 }
 0x6e5   :  { %v3073_v40 = vmul.f32 %v4471_v39, %v4463_v43  ;;  %4280 = vmatprep.subr.mxu0 %v4498_v11 }
 0x6e7   :  { %4268 = vmatmul.mubr.msk.f32.vlgmr.msra.gmra.mrb[42].mxu1 %vm927_vm2, %v3073_v40 }
 0x6e8   :  { %4276 = vmatpush3.msra.mxu1 %v4908_v22  ;;  %4277 = vmatprep.mubr.msk.f32.mxu1 %vm4497_vm0, %v4498_v11 }
 0x6e9   :  { %4285 = vmatprep.subr.mxu1 %v4498_v11 }
 0x7ae   :  { %v3143_v41 = vpop.f32.mrb[40].mxu0 }
 0x7af   :  { %v4254_v42 = vpop.f32.mrb[41].mxu0  ;;  %4273 = vmatmul.mubr.msk.f32.vlgmr.msra.gmra.mrb[44].mxu0 %vm927_vm2, %v3143_v41 }
 0x7b0   :  { %4281 = vmatpush3.msra.mxu0 %v4915_v23  ;;  %4282 = vmatprep.mubr.msk.f32.mxu0 %vm4497_vm0, %v4498_v11 }
 0x7b2   :  { %v3216_v48 = vpop.f32.mrb[40].mxu1 }
 0x7b3   :  { %v4259_v45 = vpop.f32.mrb[41].mxu1  ;;  %4278 = vmatmul.mubr.msk.f32.vlgmr.msra.gmra.mrb[44].mxu1 %vm927_vm2, %v3216_v48 }
 0x7b4   :  { %4286 = vmatpush3.msra.mxu1 %v4925_v28  ;;  %4287 = vmatprep.mubr.msk.f32.mxu1 %vm4497_vm0, %v4498_v11 }
 0x7b6   :  { %v3289_v22 = vpop.f32.mrb[42].mxu0 }
 0x7b7   :  { %v4264_v46 = vpop.f32.mrb[43].mxu0  ;;  %4283 = vmatmul.mubr.msk.f32.vlgmr.msra.gmra.mrb[46].mxu0 %vm927_vm2, %v3289_v22 }
 0x7ba   :  { %v3362_v51 = vpop.f32.mrb[42].mxu1 }
 0x7bb   :  { %v4269_v52 = vpop.f32.mrb[43].mxu1  ;;  %4288 = vmatmul.mubr.msk.f32.vlgmr.msra.gmra.mrb[46].mxu1 %vm927_vm2, %v3362_v51 }
 0x882   :  { %v3435_v23 = vpop.f32.mrb[44].mxu0 }
 0x883   :  { %v4274_v53 = vpop.f32.mrb[45].mxu0 }
 0x886   :  { %v3508_v54 = vpop.f32.mrb[44].mxu1 }
 0x887   :  { %v3658_v57 = vadd.f32 %v3508_v54, %v3435_v23  ;;  %v4279_v59 = vpop.f32.mrb[45].mxu1 }
 0x88a   :  { %v3581_v61 = vpop.f32.mrb[46].mxu0 }
 0x88b   :  { %v3659_v63 = vadd.f32 %v3658_v57, %v3581_v61  ;;  %v4284_v0 = vpop.f32.mrb[47].mxu0 }
 0x88e   :  { %v3654_v28 = vpop.f32.mrb[46].mxu1 }
 0x88f   :  { %v3660_v11 = vadd.f32 %v3659_v63, %v3654_v28  ;;  %v4289_v1 = vpop.f32.mrb[47].mxu1 }
 0x891   :  { %v3661_v5 = vadd.f32 %v5042_v26, %v3660_v11 }
 0x893   :  { %3663 = vst [vmem:[#allocation2 + $0x8] sm:$0xff] %v3661_v5 }
 0x894   :  { %4483 = shalt.err (!%p4480_p4)
}
 0x895   :  { %s4484_s7 = scalar_lea.hbm %s5136_s6, 256 }
 0x896   :  { %p4485_p5 = scmp.ne.s32.totalorder %s5136_s6, %s4484_s7  ;;  %p4488_p6 = scmp.lt.u32.totalorder %s4484_s7, %s5136_s6 }
 0x898   :  { %p4490_p7 = pnand %p4488_p6, %p4485_p5 }
 0x89a   :  { %4493 = shalt.err (!%p4490_p7)
}
 0x89b   :  { %s4500_s11 = smov 128   ;;  %s4501_s12 = smov 8  }
 0x89c   :  { %3675 = dma.vmem_to_hbm [thread:$0]  %s3670_s27, 256, %s5136_s6, [#allocation3], %s4500_s11, %s4500_s11, %s4501_s12  }
 0x89d   :  { %4494 = dma.done.wait [#allocation3], 256  }
 0x89e   :  { %4495 = vsyncadd [#allocation3], 4294967040 }
 0x89f   :  { %3679 = vsyncpa [#allocation3], 1 }

</bundles_post_ra>
